<compile_context>
chip_gen: v6e
topology: v6e:2x2x1
jax: 0.10.0
libtpu: 0.0.40
codegen_flags: <defaults>
</compile_context>

<pallas_src>
import functools
import numpy as np
import jax
import jax.numpy as jnp
from jax.experimental import pallas as pl
from jax.experimental.pallas import tpu as pltpu

EPS = 1e-5
_PARALLEL = pltpu.CompilerParams(dimension_semantics=("parallel",))


# ----------------------------- in-kernel helpers ----------------------------

def _sep_resample(x3, ah4, aw4):
    """Separable spatial resampling (bilinear or adaptive-avg-pool).

    x3  : (Hin, Win, C)
    ah4 : (Hout, Hin, 1, 1)  row weights
    aw4 : (1, Wout, Win, 1)  col weights
    returns (Hout, Wout, C)
    """
    # rows:  t[ho, w, c]  = sum_h ah[ho, h] * x[h, w, c]
    t = jnp.sum(ah4 * x3[None, :, :, :], axis=1)        # (Hout, Win, C)
    # cols:  y[ho, wo, c] = sum_w aw[wo, w] * t[ho, w, c]
    y = jnp.sum(aw4 * t[:, None, :, :], axis=2)         # (Hout, Wout, C)
    return y


# ------------------------------ Pallas kernels ------------------------------

def _bnrc1_kernel(*refs, n_in):
    # Fused: (virtual concat of n_in inputs) -> BN -> ReLU -> 1x1 conv + bias.
    # refs = [x_1..x_n, scale_1..n, shift_1..n, w_1..n, bias, out]
    xs = refs[:n_in]
    ss = refs[n_in:2 * n_in]
    bs = refs[2 * n_in:3 * n_in]
    ws = refs[3 * n_in:4 * n_in]
    bias_ref = refs[4 * n_in]
    o_ref = refs[4 * n_in + 1]
    acc = None
    for xr, sr, br, wr in zip(xs, ss, bs, ws):
        a = jnp.maximum(xr[0] * sr[...] + br[...], 0.0)          # (HW, Ci)
        d = jnp.dot(a, wr[...], preferred_element_type=jnp.float32)
        acc = d if acc is None else acc + d
    o_ref[...] = (acc + bias_ref[...])[None]                     # (1, HW, Cout)


def _upsample_blend_kernel(x_ref, skip_ref, ah_ref, aw_ref, s_ref, b_ref,
                           w_ref, bias_ref, o_ref, pad_ref, *, k):
    # Fused: bilinear upsample x -> + skip -> BN -> ReLU -> kxk 'same' conv.
    Hp, Wp, C = pad_ref.shape
    p = k // 2
    Ho, Wo = Hp - 2 * p, Wp - 2 * p
    cout = o_ref.shape[-1]

    up = _sep_resample(x_ref[0], ah_ref[...], aw_ref[...])       # (Ho, Wo, C)
    a = jnp.maximum((up + skip_ref[0]) * s_ref[...] + b_ref[...], 0.0)

    # zero-padded halo in VMEM scratch (no host-side jnp.pad)
    pad_ref[...] = jnp.zeros_like(pad_ref)
    pad_ref[p:p + Ho, p:p + Wo, :] = a

    acc = jnp.zeros((Ho * Wo, cout), jnp.float32) + bias_ref[...]
    for dy in range(k):
        for dx in range(k):
            patch = pad_ref[dy:dy + Ho, dx:dx + Wo, :].reshape(Ho * Wo, C)
            acc = acc + jnp.dot(patch, w_ref[dy, dx],
                                preferred_element_type=jnp.float32)
    o_ref[...] = acc[None]                                       # (1, Ho*Wo, Cout)


def _spp_level_kernel(x_ref, ph_ref, pw_ref, uh_ref, uw_ref, s_ref, b_ref,
                      w_ref, bias_ref, o_ref, *, gh, gw):
    # Fused SPP level: adaptive avg-pool -> BN -> ReLU -> 1x1 conv -> bilinear up.
    C = x_ref.shape[-1]
    L = w_ref.shape[-1]
    pooled = _sep_resample(x_ref[0], ph_ref[...], pw_ref[...])   # (gh, gw, C)
    a = jnp.maximum(pooled * s_ref[...] + b_ref[...], 0.0)
    lvl = jnp.dot(a.reshape(gh * gw, C), w_ref[...],
                  preferred_element_type=jnp.float32) + bias_ref[...]
    lvl3 = lvl.reshape(gh, gw, L)
    y = _sep_resample(lvl3, uh_ref[...], uw_ref[...])            # (H, W, L)
    o_ref[...] = y[None]


# ------------------------------ host-side glue -------------------------------

def _fold_bn(prm):
    inv = prm['gamma'] / jnp.sqrt(prm['var'] + EPS)
    return inv, prm['beta'] - prm['mean'] * inv


def _bilinear_matrix(n_in, n_out):
    # F.interpolate(..., mode='bilinear', align_corners=False) 1-D weights.
    A = np.zeros((n_out, n_in), np.float32)
    scale = n_in / n_out
    for o in range(n_out):
        src = (o + 0.5) * scale - 0.5
        src = min(max(src, 0.0), n_in - 1)
        lo = int(np.floor(src))
        hi = min(lo + 1, n_in - 1)
        w = src - lo
        A[o, lo] += 1.0 - w
        A[o, hi] += w
    return A


def _adaptive_avg_matrix(n_in, n_out):
    # F.adaptive_avg_pool2d 1-D bin weights.
    A = np.zeros((n_out, n_in), np.float32)
    for o in range(n_out):
        start = (o * n_in) // n_out
        end = -((-(o + 1) * n_in) // n_out)     # ceil((o+1)*n_in/n_out)
        A[o, start:end] = 1.0 / (end - start)
    return A


def bnreluconv1x1(xs, prm):
    """Fused [channel-concat ->] BN -> ReLU -> 1x1 conv.  xs: NHWC or list."""
    if not isinstance(xs, (list, tuple)):
        xs = [xs]
    N, H, W, _ = xs[0].shape
    cins = [int(x.shape[-1]) for x in xs]
    cout = int(prm['w'].shape[-1])
    hw = H * W

    scale, shift = _fold_bn(prm)
    w2 = prm['w'].reshape(-1, cout)             # k == 1
    offs = np.cumsum([0] + cins)
    ss = [scale[offs[i]:offs[i + 1]].reshape(1, -1) for i in range(len(cins))]
    bs = [shift[offs[i]:offs[i + 1]].reshape(1, -1) for i in range(len(cins))]
    ws = [w2[offs[i]:offs[i + 1], :] for i in range(len(cins))]
    bias = prm['b'].reshape(1, cout)
    x2s = [x.reshape(N, hw, c) for x, c in zip(xs, cins)]

    n_in = len(xs)
    in_specs = (
        [pl.BlockSpec((1, hw, c), lambda n: (n, 0, 0)) for c in cins] +
        [pl.BlockSpec((1, c), lambda n: (0, 0)) for c in cins] +
        [pl.BlockSpec((1, c), lambda n: (0, 0)) for c in cins] +
        [pl.BlockSpec((c, cout), lambda n: (0, 0)) for c in cins] +
        [pl.BlockSpec((1, cout), lambda n: (0, 0))])

    out = pl.pallas_call(
        functools.partial(_bnrc1_kernel, n_in=n_in),
        out_shape=jax.ShapeDtypeStruct((N, hw, cout), jnp.float32),
        grid=(N,),
        in_specs=in_specs,
        out_specs=pl.BlockSpec((1, hw, cout), lambda n: (n, 0, 0)),
        compiler_params=_PARALLEL,
    )(*x2s, *ss, *bs, *ws, bias)
    return out.reshape(N, H, W, cout)


def upsample_block(x, skip, prm):
    # _Upsample.forward(x, skip): bottleneck(skip), upsample x to skip size,
    # add skip (use_skip=True), blend 3x3 BNReluConv -- last three fused.
    skip = bnreluconv1x1(skip, prm['bottleneck'])
    N, Hin, Win, C = x.shape
    _, Ho, Wo, _ = skip.shape
    blend = prm['blend']
    k = blend['k']
    p = k // 2
    cout = int(blend['w'].shape[-1])
    scale, shift = _fold_bn(blend)

    ah4 = jnp.asarray(_bilinear_matrix(Hin, Ho)).reshape(Ho, Hin, 1, 1)
    aw4 = jnp.asarray(_bilinear_matrix(Win, Wo)).reshape(1, Wo, Win, 1)

    out = pl.pallas_call(
        functools.partial(_upsample_blend_kernel, k=k),
        out_shape=jax.ShapeDtypeStruct((N, Ho * Wo, cout), jnp.float32),
        grid=(N,),
        in_specs=[pl.BlockSpec((1, Hin, Win, C), lambda n: (n, 0, 0, 0)),
                  pl.BlockSpec((1, Ho, Wo, C), lambda n: (n, 0, 0, 0)),
                  pl.BlockSpec((Ho, Hin, 1, 1), lambda n: (0, 0, 0, 0)),
                  pl.BlockSpec((1, Wo, Win, 1), lambda n: (0, 0, 0, 0)),
                  pl.BlockSpec((1, 1, C), lambda n: (0, 0, 0)),
                  pl.BlockSpec((1, 1, C), lambda n: (0, 0, 0)),
                  pl.BlockSpec((k, k, C, cout), lambda n: (0, 0, 0, 0)),
                  pl.BlockSpec((1, cout), lambda n: (0, 0))],
        out_specs=pl.BlockSpec((1, Ho * Wo, cout), lambda n: (n, 0, 0)),
        scratch_shapes=[pltpu.VMEM((Ho + 2 * p, Wo + 2 * p, C), jnp.float32)],
        compiler_params=_PARALLEL,
    )(x, skip, ah4, aw4, scale.reshape(1, 1, C), shift.reshape(1, 1, C),
      blend['w'], blend['b'].reshape(1, cout))
    return out.reshape(N, Ho, Wo, cout)


def spp_level(x, prm, gh, gw):
    N, H, W, C = x.shape
    L = int(prm['w'].shape[-1])
    scale, shift = _fold_bn(prm)
    ph4 = jnp.asarray(_adaptive_avg_matrix(H, gh)).reshape(gh, H, 1, 1)
    pw4 = jnp.asarray(_adaptive_avg_matrix(W, gw)).reshape(1, gw, W, 1)
    uh4 = jnp.asarray(_bilinear_matrix(gh, H)).reshape(H, gh, 1, 1)
    uw4 = jnp.asarray(_bilinear_matrix(gw, W)).reshape(1, W, gw, 1)

    return pl.pallas_call(
        functools.partial(_spp_level_kernel, gh=gh, gw=gw),
        out_shape=jax.ShapeDtypeStruct((N, H, W, L), jnp.float32),
        grid=(N,),
        in_specs=[pl.BlockSpec((1, H, W, C), lambda n: (n, 0, 0, 0)),
                  pl.BlockSpec((gh, H, 1, 1), lambda n: (0, 0, 0, 0)),
                  pl.BlockSpec((1, gw, W, 1), lambda n: (0, 0, 0, 0)),
                  pl.BlockSpec((H, gh, 1, 1), lambda n: (0, 0, 0, 0)),
                  pl.BlockSpec((1, W, gw, 1), lambda n: (0, 0, 0, 0)),
                  pl.BlockSpec((1, 1, C), lambda n: (0, 0, 0)),
                  pl.BlockSpec((1, 1, C), lambda n: (0, 0, 0)),
                  pl.BlockSpec((C, L), lambda n: (0, 0)),
                  pl.BlockSpec((1, L), lambda n: (0, 0))],
        out_specs=pl.BlockSpec((1, H, W, L), lambda n: (n, 0, 0, 0)),
        compiler_params=_PARALLEL,
    )(x, ph4, pw4, uh4, uw4, scale.reshape(1, 1, C), shift.reshape(1, 1, C),
      prm['w'].reshape(C, L), prm['b'].reshape(1, L))


def spp_forward(x, p, grids=(8, 4, 2, 1), num_levels=3, square_grid=False):
    # SpatialPyramidPooling.forward (drop_rate == 0.0 -> dropout is identity)
    _, H, W, _ = x.shape
    ar = W / H
    x = bnreluconv1x1(x, p['spp_bn'])
    levels = [x]
    for i in range(num_levels):
        g = grids[i]
        gh, gw = (g, g) if square_grid else (g, max(1, int(round(ar * g))))
        levels.append(spp_level(x, p['levels'][i], gh, gw))
    # channel concat + 1x1 BNReluConv fused into one call (sum of per-part matmuls)
    return bnreluconv1x1(levels, p['spp_fuse'])


# ------------------------- parameters / init ---------------------------------

def _init_bnreluconv(key, cin, cout, k):
    # kaiming-normal (fan_out, relu) conv weight; bias 0; BN gamma=1, beta=0,
    # running stats (0, 1) -> deterministic inference-mode init.
    std = float(np.sqrt(2.0 / (cout * k * k)))
    w = jax.random.normal(key, (k, k, cin, cout), jnp.float32) * std
    return dict(k=k, w=w, b=jnp.zeros((cout,), jnp.float32),
                gamma=jnp.ones((cin,), jnp.float32),
                beta=jnp.zeros((cin,), jnp.float32),
                mean=jnp.zeros((cin,), jnp.float32),
                var=jnp.ones((cin,), jnp.float32))


def init_swiftnet_params(key, up_features, num_features, num_classes,
                         num_levels=3):
    keys = iter(jax.random.split(key, 16))
    level_size = num_features // num_levels
    spp = dict(
        spp_bn=_init_bnreluconv(next(keys), up_features[3], num_features, 1),
        levels=[_init_bnreluconv(next(keys), num_features, level_size, 1)
                for _ in range(num_levels)],
        spp_fuse=_init_bnreluconv(next(keys),
                                  num_features + num_levels * level_size,
                                  num_features, 1),
    )
    ups = []
    for skip_ch in up_features[:3]:
        ups.append(dict(
            bottleneck=_init_bnreluconv(next(keys), skip_ch, num_features, 1),
            blend=_init_bnreluconv(next(keys), num_features, num_features, 3)))
    upsample = list(reversed(ups))          # num_up_remove = 0 (output_stride=4)
    logits = _init_bnreluconv(next(keys), num_features, num_classes, 1)
    return dict(spp=spp, upsample=upsample, logits=logits)


# --------------------------- synthetic backbone ------------------------------

def _avgpool2(x):
    N, H, W, C = x.shape
    return x.reshape(N, H // 2, 2, W // 2, 2, C).mean(axis=(2, 4))


class SyntheticBackbone:
    """Deterministic stand-in backbone (external module -> plain-JAX glue);
    features at strides 4/8/16/32."""
    block_features = (8, 16, 24, 32)

    def __init__(self, key):
        keys = jax.random.split(key, 4)
        self.ws, self.bs = [], []
        cin = 3
        for kk, cout in zip(keys, self.block_features):
            std = float(np.sqrt(2.0 / cout))
            self.ws.append(jax.random.normal(kk, (cin, cout), jnp.float32) * std)
            self.bs.append(jnp.zeros((cout,), jnp.float32))
            cin = cout

    def forward_features(self, img_nhwc):
        x = _avgpool2(_avgpool2(img_nhwc))                   # stride-4 stem
        feats = []
        for i, (w, b) in enumerate(zip(self.ws, self.bs)):
            x = jnp.maximum(jnp.einsum('nhwc,cd->nhwd', x, w) + b, 0.0)
            feats.append(x)
            if i < len(self.ws) - 1:
                x = _avgpool2(x)
        return feats                                         # [s4, s8, s16, s32]


# ------------------------------- SwiftNet ------------------------------------

def swiftnet_forward(image_nchw, params, backbone):
    x = jnp.transpose(image_nchw, (0, 2, 3, 1))              # NCHW -> NHWC
    feats = backbone.forward_features(x)                     # forward_down
    feats = feats[::-1]                                      # forward_up
    y = spp_forward(feats[0], params['spp'])                 # segblocks.no_blocks(spp)
    for skip, up in zip(feats[1:], params['upsample']):
        y = upsample_block(y, skip, up)
    y = bnreluconv1x1(y, params['logits'])
    return jnp.transpose(y, (0, 3, 1, 2))                    # NHWC -> NCHW


if __name__ == "__main__":
    key = jax.random.PRNGKey(0)
    k_img, k_backbone, k_params = jax.random.split(key, 3)

    num_features = 24            # divisible by 3 SPP levels
    num_classes = 5
    image = jax.random.normal(k_img, (2, 3, 64, 64), jnp.float32)   # NCHW

    backbone = SyntheticBackbone(k_backbone)
    params = init_swiftnet_params(k_params, backbone.block_features,
                                  num_features, num_classes)

    out = swiftnet_forward(image, params, backbone)
    out = jax.block_until_ready(out)
    assert out.shape == (2, num_classes, 16, 16), out.shape
    assert bool(jnp.all(jnp.isfinite(out)))
    print("KERNEL_OK")
</pallas_src>

<mosaic_0001>
module attributes {stable_mosaic.version = 11 : i64} {
  func.func @_bnrc1_kernel(%arg0: i32, %arg1: memref<1x4x32xf32, #tpu.memory_space<vmem>>, %arg2: memref<1x32xf32, #tpu.memory_space<vmem>>, %arg3: memref<1x32xf32, #tpu.memory_space<vmem>>, %arg4: memref<32x24xf32, #tpu.memory_space<vmem>>, %arg5: memref<1x24xf32, #tpu.memory_space<vmem>>, %arg6: memref<1x4x24xf32, #tpu.memory_space<vmem>>) attributes {dimension_semantics = [#tpu.dimension_semantics<parallel>], iteration_bounds = array<i64: 2>, scalar_prefetch = 0 : i64, scratch_operands = 0 : i64, tpu.core_type = #tpu.core_type<tc>, window_params = [{transform_indices = @transform_0, window_bounds = array<i64: 1, 4, 32>}, {pipeline_mode = #tpu.pipeline_mode<synchronous>, transform_indices = @transform_1, window_bounds = array<i64: 1, 32>}, {pipeline_mode = #tpu.pipeline_mode<synchronous>, transform_indices = @transform_2, window_bounds = array<i64: 1, 32>}, {pipeline_mode = #tpu.pipeline_mode<synchronous>, transform_indices = @transform_3, window_bounds = array<i64: 32, 24>}, {pipeline_mode = #tpu.pipeline_mode<synchronous>, transform_indices = @transform_4, window_bounds = array<i64: 1, 24>}, {transform_indices = @transform_5, window_bounds = array<i64: 1, 4, 24>}]} {
    %c0 = arith.constant 0 : index
    %c0_0 = arith.constant 0 : index
    %c0_1 = arith.constant 0 : index
    %0 = vector.load %arg1[%c0, %c0_0, %c0_1] : memref<1x4x32xf32, #tpu.memory_space<vmem>>, vector<1x4x32xf32>
    %1 = vector.shape_cast %0 : vector<1x4x32xf32> to vector<4x32xf32>
    %c0_2 = arith.constant 0 : index
    %c0_3 = arith.constant 0 : index
    %2 = vector.load %arg2[%c0_2, %c0_3] : memref<1x32xf32, #tpu.memory_space<vmem>>, vector<1x32xf32>
    %3 = vector.broadcast %2 : vector<1x32xf32> to vector<4x32xf32>
    %4 = arith.mulf %1, %3 : vector<4x32xf32>
    %c0_4 = arith.constant 0 : index
    %c0_5 = arith.constant 0 : index
    %5 = vector.load %arg3[%c0_4, %c0_5] : memref<1x32xf32, #tpu.memory_space<vmem>>, vector<1x32xf32>
    %6 = vector.broadcast %5 : vector<1x32xf32> to vector<4x32xf32>
    %7 = arith.addf %4, %6 : vector<4x32xf32>
    %cst = arith.constant 0.000000e+00 : f32
    %8 = vector.broadcast %cst : f32 to vector<4x32xf32>
    %9 = arith.maximumf %7, %8 : vector<4x32xf32>
    %c0_6 = arith.constant 0 : index
    %c0_7 = arith.constant 0 : index
    %10 = vector.load %arg4[%c0_6, %c0_7] : memref<32x24xf32, #tpu.memory_space<vmem>>, vector<32x24xf32>
    %cst_8 = arith.constant dense<0.000000e+00> : vector<4x24xf32>
    %11 = tpu.matmul %9, %10, %cst_8 {dimension_numbers = #tpu.dot_dimension_numbers<[1], [0], [0], [1], [0, 0, 1, 1], [], []>} : vector<4x32xf32>, vector<32x24xf32>, vector<4x24xf32> -> vector<4x24xf32>
    %c0_9 = arith.constant 0 : index
    %c0_10 = arith.constant 0 : index
    %12 = vector.load %arg5[%c0_9, %c0_10] : memref<1x24xf32, #tpu.memory_space<vmem>>, vector<1x24xf32>
    %13 = vector.broadcast %12 : vector<1x24xf32> to vector<4x24xf32>
    %14 = arith.addf %11, %13 : vector<4x24xf32>
    %15 = vector.shape_cast %14 : vector<4x24xf32> to vector<1x4x24xf32>
    %c0_11 = arith.constant 0 : index
    %c0_12 = arith.constant 0 : index
    %c0_13 = arith.constant 0 : index
    %16 = vector.load %arg6[%c0_11, %c0_12, %c0_13] : memref<1x4x24xf32, #tpu.memory_space<vmem>>, vector<1x4x24xf32>
    tpu.vector_store %arg6[%c0_11, %c0_12, %c0_13], %15 {strides = array<i32>} : memref<1x4x24xf32, #tpu.memory_space<vmem>>, vector<1x4x24xf32>,
    return
  }
  func.func @transform_0(%arg0: i32) -> (i32, i32, i32) {
    %c0_i32 = arith.constant 0 : i32
    %c0_i32_0 = arith.constant 0 : i32
    %c0_i32_1 = arith.constant 0 : i32
    return %arg0, %c0_i32, %c0_i32_0 : i32, i32, i32
  }
  func.func @transform_1(%arg0: i32) -> (i32, i32) {
    %c0_i32 = arith.constant 0 : i32
    %c0_i32_0 = arith.constant 0 : i32
    %c0_i32_1 = arith.constant 0 : i32
    return %c0_i32, %c0_i32_0 : i32, i32
  }
  func.func @transform_2(%arg0: i32) -> (i32, i32) {
    %c0_i32 = arith.constant 0 : i32
    %c0_i32_0 = arith.constant 0 : i32
    %c0_i32_1 = arith.constant 0 : i32
    return %c0_i32, %c0_i32_0 : i32, i32
  }
  func.func @transform_3(%arg0: i32) -> (i32, i32) {
    %c0_i32 = arith.constant 0 : i32
    %c0_i32_0 = arith.constant 0 : i32
    %c0_i32_1 = arith.constant 0 : i32
    return %c0_i32, %c0_i32_0 : i32, i32
  }
  func.func @transform_4(%arg0: i32) -> (i32, i32) {
    %c0_i32 = arith.constant 0 : i32
    %c0_i32_0 = arith.constant 0 : i32
    %c0_i32_1 = arith.constant 0 : i32
    return %c0_i32, %c0_i32_0 : i32, i32
  }
  func.func @transform_5(%arg0: i32) -> (i32, i32, i32) {
    %c0_i32 = arith.constant 0 : i32
    %c0_i32_0 = arith.constant 0 : i32
    %c0_i32_1 = arith.constant 0 : i32
    return %arg0, %c0_i32, %c0_i32_0 : i32, i32, i32
  }
}

</mosaic_0001>

<bundles_post_ra>
// kernel: tpu_custom_call.1
= control target key start
LH: loop header
LB: loop body
LE: loop exit
PB: predicated region body
PF: predicated region fallthrough
CT: control target
= control target key end

     0   :  { %10 = vsyncpa [#allocation3], 0  ;;  %s678_s0 = inlined_call_operand.vmem [shape: f32[2,4,32], index: 0, kind: input, shape index: {}]   ;;  %s679_s1 = inlined_call_operand.vmem [shape: f32[1,32], index: 1, kind: input, shape index: {}]   ;;  %s680_s2 = inlined_call_operand.vmem [shape: f32[1,32], index: 2, kind: input, shape index: {}]   ;;  %s681_s3 = inlined_call_operand.vmem [shape: f32[32,24], index: 3, kind: input, shape index: {}]   ;;  %s682_s4 = inlined_call_operand.vmem [shape: f32[1,24], index: 4, kind: input, shape index: {}]   ;;  %s683_s5 = inlined_call_operand.hbm [shape: f32[2,4,24], index: 5, kind: output, shape index: {}]  }
   0x1   :  { %12 = vsyncpa [#allocation3 + $0x1], 0  ;;  %s564_s18 = smov 0   ;;  %s566_s19 = smov 0  }
   0x2   :  { %s568_s20 = smov 0   ;;  %s570_s21 = smov 0  }
   0x3 LB: > { %s585_s22 = sadd.s32 4294967295, %s529_s21   ;;  %s398_s23 = sadd.s32 4294967294, %s529_s21   ;;  %s529_s21 = sphi %s570_s21, %s689_s21   ;;  %s525_s20 = sphi %s568_s20, %s688_s20   ;;  %s521_s19 = sphi %s566_s19, %s687_s19   ;;  %s517_s18 = sphi %s564_s18, %s686_s18  }
   0x4   : > { %s589_s24 = sadd.s32 1, %s529_s21   ;;  %s135_s25 = sadd.s32 1, %s525_s20 }
   0x5   : > { %s132_s26 = ssub.s32 %s529_s21, %s589_s24  ;;  %p145_p0 = scmp.ne.s32.totalorder %s525_s20, %s521_s19 }
   0x6   : > { %p133_p1 = scmp.eq.s32.totalorder %s132_s26, 0  ;;  %p146_p2 = scmp.eq.s32.totalorder %s585_s22, 1 }
   0x7   : > { %p151_p3 = scmp.ne.s32.totalorder %s521_s19, %s517_s18  ;;  %p152_p4 = scmp.eq.s32.totalorder %s398_s23, 1 }
   0x8   : > { %s600_s27 = scalar_select %p133_p1, %s525_s20, %s135_s25  }
   0x9   : > { %p602_p5 = por %p146_p2, %p145_p0  ;;  %p606_p6 = por %p152_p4, %p151_p3 }
   0xa   : > { %p401_p7 = scmp.ge.s32.totalorder %s529_s21, 1  ;;  %p189_p8 = scmp.lt.s32.totalorder %s529_s21, 3 }
   0xc   : > { %p190_p9 = pnand %p401_p7, %p189_p8 }
   0xd   : > { %p216_p10 = scmp.lt.s32.totalorder (!%p190_p9), %s585_s22, 1  ;;  %s213_s6 = sand.u32 (!%p190_p9), 1, %s521_s19  }
   0xe   : > { %193 = sbr.rel (%p190_p9) target bundleno = 238 (0xee), region = 40  ;;  %s402_s7 = sshll.u32 (!%p190_p9), %s213_s6, 2 }
   0xf   : > { %s409_s10 = sshll.u32 (!%p190_p9), %s585_s22, 6  ;;  %s215_s11 = scalar_lea.vmem (!%p190_p9), [#allocation2], %s402_s7 }
  0x10   : > { %s643_s15 = scalar_lea.hbm (!%p190_p9), %s683_s5, %s409_s10  ;;  %s326_s16 = scalar_lea.sflag (!%p190_p9), [#allocation3], %s213_s6 }
  0x13   : > { %v241_v0 = vld [vmem:[%s681_s3 + $0x18] sm:$0xff]  ;;  %v531_v1 = vmov 0.0   ;;  %v240_v2 = vld [vmem:[%s681_s3 + $0x10] sm:$0xff]  ;;  %vm532_vm0 = vmmov 0   ;;  %s217_s9 = scalar_select %p216_p10, %s585_s22, 1  ;;  %v239_v3 = vld [vmem:[%s681_s3 + $0x8] sm:$0xff] }
  0x14   : > { %417 = vmatprep.subr.mxu0 %v531_v1  ;;  %425 = vmatprep.mubr.msk.f32.mxu0 %vm532_vm0, %v531_v1  ;;  %v404_v4 = vld [vmem:[%s679_s1] ss:$0 sm:$0xff]  ;;  %vm249_vm1 = vcmask 261120   ;;  %vm323_vm2 = vcmask 191488   ;;  %s533_s22 = smov [#allocation2]  }
  0x15   : > { %418 = vmatpush3.msra.mxu0 %v241_v0  ;;  %s403_s12 = sshll.u32 %s217_s9, 2  ;;  %v238_v5 = vld [vmem:[%s681_s3] sm:$0xff]  ;;  %s473_s23 = sshll.u32 %s533_s22, 4  ;;  %s474_s23 = int_to_ptr.vmem [resolvable:$false] %s473_s23 }
  0x16   : > { %419 = vmatprep.subr.mxu0 %v531_v1  ;;  %s219_s25 = scalar_lea.vmem %s678_s0, %s403_s12  ;;  %v405_v7 = vld [vmem:[%s680_s2] ss:$0 sm:$0xff]  ;;  %s339_s12 = sshll.u32 %s215_s11, 4  ;;  %s340_s12 = int_to_ptr.vmem [resolvable:$true] %s339_s12 }
  0x17   : > { %420 = vmatpush3.msra.mxu0 %v240_v2  ;;  %v220_v6 = vld [vmem:[%s219_s25] sm:$0xf]  ;;  %s469_s17 = scalar_lea.vmem %s340_s12, 64  ;;  %s475_s25 = scalar_lea.vmem %s474_s23, 128 }
  0x18   : > { %421 = vmatprep.subr.mxu0 %v531_v1  ;;  %v228_v8 = vmul.f32 %v404_v4, %v220_v6  ;;  %v406_v11 = vld [vmem:[%s682_s4] ss:$0 sm:$0xff]  ;;  %p470_p11 = scmp.ne.s32.totalorder %s340_s12, %s469_s17  ;;  %p476_p0 = scmp.lt.s32.totalorder %s340_s12, %s474_s23 }
  0x19   : > { %422 = vmatpush3.msra.mxu0 %v239_v3  ;;  %p477_p1 = scmp.lt.s32.totalorder %s475_s25, %s469_s17 }
  0x1a   : > { %423 = vmatprep.subr.mxu0 %v531_v1  ;;  %v236_v9 = vadd.f32 %v405_v7, %v228_v8  ;;  %p471_p12 = pnand %p470_p11, %p602_p5 }
  0x1b   : > { %424 = vmatpush3.msra.mxu0 %v238_v5  ;;  %p478_p2 = por %p477_p1, %p476_p0 }
  0x1c   : > { %v237_v10 = vmax.f32 %v236_v9, 0.0  ;;  %p472_p13 = pneg %p471_p12 }
  0x1e   : > { %426 = vmatmul.mubr.msk.f32.vlgmr.msra.gmra.mxu0 %vm249_vm1, %v237_v10  ;;  %p479_p3 = pnand %p478_p2, %p472_p13 }
  0xde   : > { %v319_v12 = vpop.f32.mrf.mxu0 }
  0xdf   : > { %v320_v13 = vadd.f32 %v406_v11, %v319_v12 }
  0xe0   : > { %v427_v14 = vpop.f32.mrf.mxu0 }
  0xe1   : > { %324 = vst.msk [vmem:[%s215_s11] sm:$0xf] %vm323_vm2, %v320_v13 }
  0xe2   : > { %482 = shalt.err (!%p479_p3)
}
  0xe3   : > { %s483_s26 = scalar_lea.hbm %s643_s15, 64  ;;  %s487_s7 = scalar_lea.hbm %s683_s5, 128 }
  0xe4   : > { %p484_p4 = scmp.ne.s32.totalorder %s643_s15, %s483_s26  ;;  %p488_p9 = scmp.lt.s32.totalorder %s643_s15, %s683_s5 }
  0xe5   : > { %p489_p10 = scmp.lt.s32.totalorder %s487_s7, %s483_s26 }
  0xe6   : > { %p485_p7 = pnand %p484_p4, %p602_p5 }
  0xe7   : > { %p490_p11 = por %p489_p10, %p488_p9 }
  0xe8   : > { %p486_p8 = pneg %p485_p7 }
  0xea   : > { %p491_p12 = pnand %p490_p11, %p486_p8 }
  0xec   : > { %494 = shalt.err (!%p491_p12)
}
  0xed   : > { %428 = dma.vmem_to_hbm [thread:$0]  (%p602_p5), %s340_s12, 64, %s643_s15, %s326_s16  }
  0xee PF: > { %p434_p13 = scmp.ge.s32.totalorder %s529_s21, 2  ;;  %s351_s10 = sand.u32 1, %s517_s18  }
  0xef   : > { %s352_s11 = scalar_lea.sflag [#allocation3], %s351_s10 }
  0xf0   : > { %p431_p0 = pnand %p434_p13, %p606_p6 }
  0xf2   : > { %p432_p1 = pneg %p431_p0 }
  0xf4   : > { %512 = dma.done.wait (%p432_p1), %s352_s11, 64  }
  0xf5   : > { %514 = vsyncadd (%p432_p1), %s352_s11, 4294967232  ;;  %p15_p2 = scmp.ge.s32.totalorder %s589_s24, 4   ;;  %s686_s18 = smov %s521_s19 }
  0xf6   : > { %s687_s19 = smov %s525_s20  ;;  %s688_s20 = smov %s600_s27 }
  0xf7   : > { %s689_s21 = smov %s589_s24  ;;  %17 = sbr.rel (!%p15_p2) target bundleno = 3 (0x3), region = 75 }
  0xfc   :  { %357 = vsyncpa [#allocation3], 1 }
  0xfd   :  { %359 = vsyncpa [#allocation3 + $0x1], 1 }

</bundles_post_ra>
